<compile_context>
chip_gen: v7x
topology: tpu7x:2x2x1
jax: 0.10.0
libtpu: 0.0.40
codegen_flags: <defaults>
</compile_context>

<pallas_src>
import numpy as np
import jax
import jax.numpy as jnp
from jax.experimental import pallas as pl
from jax.experimental.pallas import tpu as pltpu


def _param_identity_kernel(p_ref, o_ref):
    # Whole-array copy of the resident parameter tile into the output tile.
    o_ref[...] = p_ref[...]


def _forward_impl(param: jax.Array) -> jax.Array:
    """Pallas equivalent of ModelWithParameterList.forward() -> module[0]."""
    return pl.pallas_call(
        _param_identity_kernel,
        out_shape=jax.ShapeDtypeStruct(param.shape, param.dtype),
        # Gridless call: full-array blocks resident in VMEM, kernel body runs
        # exactly once.  Full-extent (10, 10) blocks satisfy the TPU
        # block-shape rule without any (8, 128) padding.
        in_specs=[pl.BlockSpec(memory_space=pltpu.MemorySpace.VMEM)],
        out_specs=pl.BlockSpec(memory_space=pltpu.MemorySpace.VMEM),
        # Advisory hint: this call moves ~800 B total and does no math, so the
        # surrounding HLO schedule should not serialize behind it.
        cost_estimate=pl.CostEstimate(flops=0, transcendentals=0,
                                      bytes_accessed=800),
    )(param)


# No donation / no aliasing: the parameter stays valid across repeated calls,
# matching normal nn.Module parameter semantics.
forward = jax.jit(_forward_impl)


def init_params(key: jax.Array):
    """Deterministic parameter init mirroring the module's __init__ shapes."""
    k_param, k_w, k_b = jax.random.split(key, 3)
    # self.module = nn.ParameterList([nn.Parameter(torch.rand(10, 10))])
    param_list_0 = jax.random.uniform(k_param, (10, 10), dtype=jnp.float32)
    # self.other_layer = nn.Linear(10, 10)  (unused in forward, kept for parity)
    bound = 1.0 / float(np.sqrt(10.0))
    other_w = jax.random.uniform(k_w, (10, 10), dtype=jnp.float32,
                                 minval=-bound, maxval=bound)
    other_b = jax.random.uniform(k_b, (10,), dtype=jnp.float32,
                                 minval=-bound, maxval=bound)
    return {"module.0": param_list_0,
            "other_layer.weight": other_w,
            "other_layer.bias": other_b}


if __name__ == "__main__":
    params = init_params(jax.random.PRNGKey(0))
    expected = np.asarray(params["module.0"])

    # Correctness: forward() must return the stored parameter exactly, and the
    # parameter must remain usable across repeated calls (no donation).
    out1 = jax.block_until_ready(forward(params["module.0"]))
    out2 = jax.block_until_ready(forward(params["module.0"]))

    for out in (out1, out2):
        assert out.shape == (10, 10)
        assert out.dtype == jnp.float32
        assert np.array_equal(np.asarray(out), expected)

    print("KERNEL_OK")
</pallas_src>

<mosaic_0001>
module attributes {stable_mosaic.version = 11 : i64} {
  func.func @_param_identity_kernel(%arg0: memref<10x10xf32, #tpu.memory_space<vmem>>, %arg1: memref<10x10xf32, #tpu.memory_space<vmem>>) attributes {dimension_semantics = [], scalar_prefetch = 0 : i64, scratch_operands = 0 : i64, tpu.core_type = #tpu.core_type<tc>} {
    %c0 = arith.constant 0 : index
    %c0_0 = arith.constant 0 : index
    %0 = vector.load %arg0[%c0, %c0_0] : memref<10x10xf32, #tpu.memory_space<vmem>>, vector<10x10xf32>
    %c0_1 = arith.constant 0 : index
    %c0_2 = arith.constant 0 : index
    %1 = vector.load %arg1[%c0_1, %c0_2] : memref<10x10xf32, #tpu.memory_space<vmem>>, vector<10x10xf32>
    tpu.vector_store %arg1[%c0_1, %c0_2], %0 {strides = array<i32>} : memref<10x10xf32, #tpu.memory_space<vmem>>, vector<10x10xf32>,
    return
  }
}

</mosaic_0001>

<bundles_post_ra>
// kernel: _forward_impl.1
= control target key start
LH: loop header
LB: loop body
LE: loop exit
PB: predicated region body
PF: predicated region fallthrough
CT: control target
= control target key end

     0   :  { %6 = vsyncpa [#allocation3], 0  ;;  %s136_s0 = inlined_call_operand.hbm [shape: f32[10,10], index: 0, kind: input, shape index: {}]   ;;  %s137_s1 = inlined_call_operand.hbm [shape: f32[10,10], index: 1, kind: output, shape index: {}]  }
   0x1   :  { %7 = vsyncpa [#allocation4], 0  ;;  %s98_s6 = smov [#allocation2]   ;;  %s50_s10 = scalar_lea.hbm %s136_s0, 256 }
   0x2   :  { %s13_s7 = sshll.u32 %s98_s6, 4  ;;  %p51_p0 = scmp.ne.s32.totalorder %s136_s0, %s50_s10  ;;  %s14_s7 = int_to_ptr.vmem [resolvable:$true] %s13_s7 }
   0x3   :  { %p54_p1 = scmp.lt.u32.totalorder %s50_s10, %s136_s0 }
   0x5   :  { %p56_p2 = pnand %p54_p1, %p51_p0 }
   0x7   :  { %59 = shalt.err (!%p56_p2)
}
   0x8   :  { %s60_s15 = scalar_lea.vmem %s14_s7, 256  ;;  %p65_p4 = scmp.lt.s32.totalorder %s14_s7, %s14_s7 }
   0x9   :  { %p61_p3 = scmp.ne.s32.totalorder %s14_s7, %s60_s15  ;;  %p66_p5 = scmp.lt.s32.totalorder %s60_s15, %s60_s15 }
   0xb   :  { %p67_p6 = por %p66_p5, %p65_p4 }
   0xd   :  { %p68_p7 = pnand %p67_p6, %p61_p3 }
   0xf   :  { %71 = shalt.err (!%p68_p7)
}
  0x10   :  { %s99_s16 = smov 128   ;;  %s100_s17 = smov 8  }
  0x11   :  { %19 = dma.hbm_to_vmem [thread:$0]  %s136_s0, 256, %s14_s7, [#allocation3], %s99_s16, %s99_s16, %s100_s17  }
  0x12   :  { %94 = dma.done.wait [#allocation3], 256  }
  0x13   :  { %95 = vsyncadd [#allocation3], 4294967040  ;;  %s101_s20 = smov [#allocation5]   ;;  %vm25_vm0 = vcmask 80896   ;;  %vm27_vm1 = vcmask 74752   ;;  %v23_v0 = vld [vmem:[#allocation2] sm:$0xff] }
  0x14   :  { %s34_s21 = sshll.u32 %s101_s20, 4  ;;  %v24_v1 = vld [vmem:[#allocation2 + $0x8] sm:$0x3]  ;;  %26 = vst.msk [vmem:[#allocation5] sm:$0xff] %vm25_vm0, %v23_v0  ;;  %s35_s21 = int_to_ptr.vmem [resolvable:$true] %s34_s21 }
  0x15   :  { %28 = vst.msk [vmem:[#allocation5 + $0x8] sm:$0x3] %vm27_vm1, %v24_v1  ;;  %s72_s22 = scalar_lea.vmem %s35_s21, 256  ;;  %p77_p9 = scmp.lt.s32.totalorder %s35_s21, %s35_s21 }
  0x16   :  { %p73_p8 = scmp.ne.s32.totalorder %s35_s21, %s72_s22  ;;  %p78_p10 = scmp.lt.s32.totalorder %s72_s22, %s72_s22 }
  0x18   :  { %p79_p11 = por %p78_p10, %p77_p9 }
  0x1a   :  { %p80_p12 = pnand %p79_p11, %p73_p8 }
  0x1c   :  { %83 = shalt.err (!%p80_p12)
}
  0x1d   :  { %s84_s24 = scalar_lea.hbm %s137_s1, 256 }
  0x1e   :  { %p85_p13 = scmp.ne.s32.totalorder %s137_s1, %s84_s24  ;;  %p88_p0 = scmp.lt.u32.totalorder %s84_s24, %s137_s1 }
  0x20   :  { %p90_p1 = pnand %p88_p0, %p85_p13 }
  0x22   :  { %93 = shalt.err (!%p90_p1)
}
  0x23   :  { %40 = dma.vmem_to_hbm [thread:$0]  %s35_s21, 256, %s137_s1, [#allocation4], %s99_s16, %s99_s16, %s100_s17  }
  0x24   :  { %96 = dma.done.wait [#allocation4], 256  }
  0x25   :  { %97 = vsyncadd [#allocation4], 4294967040 }
  0x26   :  { %44 = vsyncpa [#allocation3], 1 }
  0x27   :  { %45 = vsyncpa [#allocation4], 1 }

</bundles_post_ra>
